<compile_context>
chip_gen: v7x
topology: tpu7x:2x2x1
jax: 0.10.0
libtpu: 0.0.40
codegen_flags: <defaults>
</compile_context>

<pallas_src>
import math

import jax
import jax.numpy as jnp
from jax.experimental import pallas as pl
from jax.experimental.pallas import tpu as pltpu

# Conv hyper-parameters of default_conv1d
K1, S1, C1 = 8, 4, 16
K2, S2, C2 = 4, 2, 32
LEAKY_SLOPE = 0.01                      # nn.LeakyReLU default negative_slope
K_MAX = 256                             # per-chunk contraction bound (v6e/v7x MXU width)
FULL_BAND_MAX_BYTES = 2 * 1024 * 1024   # conv2 full-band weight size threshold


def conv1d_output_size(l, kernel_size=1, stride=1, padding=0, dilation=1):
    return math.floor((l + 2 * padding - dilation * (kernel_size - 1) - 1) / stride + 1)


def _round_up(v, m):
    return -(-v // m) * m


def _plan(L, Cin, l1, l2):
    """Static tiling plan for the two banded-conv matmuls."""
    # ---- conv2: single full banded matmul (columns permuted to channel-major) when the
    # band fits comfortably in VMEM, otherwise time-chunked with 128-lane output stores.
    if (l1 * C1) * (l2 * C2) * 4 <= FULL_BAND_MAX_BYTES:
        n2, G2, l2p, l1_need = 1, l2, l2, l1
    else:
        G2 = 4 if l2 >= 4 else l2                 # 4 steps * 32 ch = 128-lane out chunks
        n2 = -(-l2 // G2)
        l2p = n2 * G2
        l1_need = (l2p - 1) * S2 + K2             # conv1 steps needed (incl. padded ones)
    # ---- conv1: chunk so the per-chunk contraction stays <= K_MAX lanes.
    l1_target = max(l1, l1_need)
    g1_cap = max(1, (K_MAX // Cin - K1) // S1 + 1)
    if g1_cap >= l1_target:
        G1, n1 = l1_target, 1                     # single banded matmul
    else:
        G1 = (g1_cap // 8) * 8 if g1_cap >= 8 else g1_cap   # 8 steps * 16 ch = 128 lanes
        G1 = max(1, min(G1, l1_target))
        n1 = -(-l1_target // G1)
    l1p = n1 * G1
    span1 = ((G1 - 1) * S1 + K1) * Cin
    span2 = l1p * C1 if n2 == 1 else ((G2 - 1) * S2 + K2) * C1
    Lp = max(L, (l1p - 1) * S1 + K1)              # padded input length (full last chunk)
    out_cols = (l2 if n2 == 1 else l2p) * C2
    return dict(n1=n1, G1=G1, l1p=l1p, span1=span1,
                n2=n2, G2=G2, l2p=l2p, span2=span2,
                Lp=Lp, out_cols=out_cols)


def _make_kernel(TB, Cin, n1, G1, span1, n2, G2, span2, out_cols):
    CH1 = G1 * C1
    CH2 = G2 * C2

    def act(v):
        return jnp.where(v >= 0, v, LEAKY_SLOPE * v)

    def kernel(x_ref, w1_ref, b1_ref, w2_ref, b2_ref, o_ref, h1_ref):
        w1b = w1_ref[...]                                       # (span1, G1*C1)
        b1b = jnp.broadcast_to(b1_ref[...], (TB, CH1))          # hoisted (no CSE in loops)

        # ---- Conv1d(Cin -> 16, k=8, s=4) + LeakyReLU: banded matmul per G1-step chunk ----
        h1_val = None
        if n1 == 1:
            h1_val = act(jnp.dot(x_ref[:, :span1], w1b,
                                 preferred_element_type=jnp.float32) + b1b)
            if n2 > 1:
                h1_ref[...] = h1_val
        else:
            # TODO(synk): switch to lax.fori_loop for very large n1 (compile time); static
            # unrolling is fine at realistic sequence lengths.
            for c in range(n1):
                s = c * G1 * S1 * Cin                           # static lane offset
                a = jnp.dot(x_ref[:, s:s + span1], w1b,
                            preferred_element_type=jnp.float32) + b1b
                h1_ref[:, c * CH1:(c + 1) * CH1] = act(a)       # lane-dense chunk store

        # ---- Conv1d(16 -> 32, k=4, s=2) + LeakyReLU ----
        if n2 == 1:
            # One banded matmul; weight columns pre-permuted to channel-major (c*l2 + t),
            # so o_ref is written directly in PyTorch's flatten order (no glue transpose).
            h1 = h1_val if n1 == 1 else h1_ref[...]
            b2b = jnp.broadcast_to(b2_ref[...], (TB, out_cols))
            o_ref[...] = act(jnp.dot(h1, w2_ref[...],
                                     preferred_element_type=jnp.float32) + b2b)
        else:
            w2b = w2_ref[...]                                   # (span2, G2*C2)
            b2b = jnp.broadcast_to(b2_ref[...], (TB, CH2))
            for c in range(n2):
                s = c * G2 * S2 * C1
                a = jnp.dot(h1_ref[:, s:s + span2], w2b,
                            preferred_element_type=jnp.float32) + b2b
                o_ref[:, c * CH2:(c + 1) * CH2] = act(a)        # 128-lane chunk store

    return kernel


def conv1d_layers_forward(x, params):
    """x: (*batch, L, C_in) float32. Returns (*batch, 32 * l2) in PyTorch flatten order."""
    w1, b1, w2, b2 = params            # PyTorch layouts: (16,Cin,8),(16,),(32,16,4),(32,)
    batch = x.shape[:-2]
    L, Cin = x.shape[-2:]
    l1 = conv1d_output_size(L, K1, S1)
    l2 = conv1d_output_size(l1, K2, S2)
    assert l1 > 0 and l2 > 0, "input length too short for default conv stack"

    p = _plan(L, Cin, l1, l2)
    n1, G1, l1p, span1 = p["n1"], p["G1"], p["l1p"], p["span1"]
    n2, G2, l2p, span2 = p["n2"], p["G2"], p["l2p"], p["span2"]
    Lp, out_cols = p["Lp"], p["out_cols"]

    # im2col weight layouts: row index k*Cin + c matches the lane index of lane-dense x.
    w1_mat = jnp.transpose(w1, (2, 1, 0)).reshape(K1 * Cin, C1).astype(jnp.float32)
    w2_mat = jnp.transpose(w2, (2, 1, 0)).reshape(K2 * C1, C2).astype(jnp.float32)

    # conv1 block-banded chunk weight: band[g*S1*Cin + r, g*C1 + o] = w1_mat[r, o]
    g1i = jnp.arange(G1)
    r1i = jnp.arange(K1 * Cin)
    o1i = jnp.arange(C1)
    w1_band = jnp.zeros((span1, G1 * C1), jnp.float32).at[
        g1i[:, None, None] * (S1 * Cin) + r1i[None, :, None],
        g1i[:, None, None] * C1 + o1i[None, None, :],
    ].set(jnp.broadcast_to(w1_mat, (G1, K1 * Cin, C1)))
    b1_vec = jnp.tile(b1.astype(jnp.float32), G1).reshape(1, G1 * C1)

    r2i = jnp.arange(K2 * C1)
    o2i = jnp.arange(C2)
    if n2 == 1:
        # Full band, columns permuted to channel-major: band[t*S2*C1 + r, o*l2 + t].
        t2i = jnp.arange(l2)
        w2_band = jnp.zeros((l1p * C1, l2 * C2), jnp.float32).at[
            t2i[:, None, None] * (S2 * C1) + r2i[None, :, None],
            o2i[None, None, :] * l2 + t2i[:, None, None],
        ].set(jnp.broadcast_to(w2_mat, (l2, K2 * C1, C2)))
        b2_vec = jnp.repeat(b2.astype(jnp.float32), l2).reshape(1, l2 * C2)
    else:
        # Per-chunk band, time-major within chunk: band[g*S2*C1 + r, g*C2 + o].
        g2i = jnp.arange(G2)
        w2_band = jnp.zeros((span2, G2 * C2), jnp.float32).at[
            g2i[:, None, None] * (S2 * C1) + r2i[None, :, None],
            g2i[:, None, None] * C2 + o2i[None, None, :],
        ].set(jnp.broadcast_to(w2_mat, (G2, K2 * C1, C2)))
        b2_vec = jnp.tile(b2.astype(jnp.float32), G2).reshape(1, G2 * C2)

    # Lane-dense input (B, Lp*Cin); zero-pad time so every conv1 chunk is full
    # (padded conv1/conv2 steps are finite and never feed valid outputs).
    xb = x.reshape(-1, L * Cin).astype(jnp.float32)
    B = xb.shape[0]
    if Lp > L:
        xb = jnp.pad(xb, ((0, 0), (0, (Lp - L) * Cin)))

    # --- batch tile policy: >=2 grid steps when B >= 16 (both v7x TCs), tiles up to 1024
    # rows to amortize per-step overhead on v5e/v6e, bounded by the scoped-VMEM budget.
    w_bytes = 4 * (w1_band.size + b1_vec.size + w2_band.size + b2_vec.size)

    def tile_bytes(tb):
        # double-buffered streamed x/out blocks + resident h1 scratch + constant weights
        return 4 * (2 * tb * Lp * Cin + tb * l1p * C1 + 2 * tb * out_cols) + w_bytes

    TB = min(1024, max(8, _round_up(pl.cdiv(B, 2), 8)))
    while TB > 8 and tile_bytes(TB) > 20 * 1024 * 1024:
        TB = max(8, _round_up(TB // 2, 8))
    n_tiles = pl.cdiv(B, TB)
    B_pad = n_tiles * TB
    if B_pad > B:
        xb = jnp.pad(xb, ((0, B_pad - B), (0, 0)))

    out = pl.pallas_call(
        _make_kernel(TB, Cin, n1, G1, span1, n2, G2, span2, out_cols),
        out_shape=jax.ShapeDtypeStruct((B_pad, out_cols), jnp.float32),
        grid_spec=pltpu.PrefetchScalarGridSpec(
            num_scalar_prefetch=0,
            grid=(n_tiles,),
            in_specs=[
                pl.BlockSpec((TB, Lp * Cin), lambda i: (i, 0)),
                pl.BlockSpec(w1_band.shape, lambda i: (0, 0)),   # constant blocks are not
                pl.BlockSpec(b1_vec.shape, lambda i: (0, 0)),    # re-fetched across steps
                pl.BlockSpec(w2_band.shape, lambda i: (0, 0)),
                pl.BlockSpec(b2_vec.shape, lambda i: (0, 0)),
            ],
            out_specs=pl.BlockSpec((TB, out_cols), lambda i: (i, 0)),
            scratch_shapes=[pltpu.VMEM((TB, l1p * C1), jnp.float32)],
        ),
        compiler_params=pltpu.CompilerParams(
            dimension_semantics=("parallel",),        # shards batch tiles over v7x's 2 TCs
            vmem_limit_bytes=32 * 1024 * 1024,        # safe on v5e/v6e/v7x; budget <= 20 MiB
        ),
    )(xb, w1_band, b1_vec, w2_band, b2_vec)

    if n2 == 1:
        hidden = out[:B].reshape(batch + (C2 * l2,))          # already channel-major
    else:
        # TODO(synk): fold this channel-major permutation into the chunked-conv2 path as
        # well (e.g. 3-D output block) to avoid the extra HBM pass for very long inputs.
        hidden = out[:B, :l2 * C2].reshape(B, l2, C2)
        hidden = jnp.transpose(hidden, (0, 2, 1)).reshape(batch + (C2 * l2,))
    # LinearLayers(conv_output_size, 64, depth=0, output_size=None) -> identity.
    return hidden


def _reference(x, params):
    """Pure-JAX reference using lax.conv_general_dilated (mirrors PyTorch)."""
    w1, b1, w2, b2 = params
    batch = x.shape[:-2]
    xb = x.reshape((-1,) + x.shape[-2:])
    xc = jnp.transpose(xb, (0, 2, 1))                   # (B, Cin, L)
    h = jax.lax.conv_general_dilated(
        xc, w1, (S1,), "VALID", dimension_numbers=("NCH", "OIH", "NCH")
    ) + b1[None, :, None]
    h = jnp.where(h >= 0, h, LEAKY_SLOPE * h)
    h = jax.lax.conv_general_dilated(
        h, w2, (S2,), "VALID", dimension_numbers=("NCH", "OIH", "NCH")
    ) + b2[None, :, None]
    h = jnp.where(h >= 0, h, LEAKY_SLOPE * h)
    return h.reshape(batch + (-1,))


if __name__ == "__main__":
    key = jax.random.PRNGKey(0)

    def make_params(k, cin):
        k1, k2, k3, k4 = jax.random.split(k, 4)
        w1 = 0.1 * jax.random.normal(k1, (C1, cin, K1), dtype=jnp.float32)
        b1 = 0.1 * jax.random.normal(k2, (C1,), dtype=jnp.float32)
        w2 = 0.1 * jax.random.normal(k3, (C2, C1, K2), dtype=jnp.float32)
        b2 = 0.1 * jax.random.normal(k4, (C2,), dtype=jnp.float32)
        return (w1, b1, w2, b2)

    fwd = jax.jit(conv1d_layers_forward)
    kx1, kp1, kx2, kp2 = jax.random.split(key, 4)

    # Case 1: small shapes (single-chunk conv1 + full-band channel-major conv2).
    # in_l=32, in_channels=4 -> l1=7, l2=2, output 64.
    x = jax.random.normal(kx1, (2, 32, 4), dtype=jnp.float32)
    params = make_params(kp1, 4)
    out = jax.block_until_ready(fwd(x, params))
    ref = _reference(x, params)
    assert out.shape == ref.shape == (2, 64), (out.shape, ref.shape)
    assert jnp.allclose(out, ref, atol=2e-3, rtol=2e-3), float(jnp.max(jnp.abs(out - ref)))

    # Case 2: exercises the chunked conv1 and chunked conv2 paths (l1=63, l2=30).
    x2 = jax.random.normal(kx2, (3, 256, 6), dtype=jnp.float32)
    params2 = make_params(kp2, 6)
    out2 = jax.block_until_ready(fwd(x2, params2))
    ref2 = _reference(x2, params2)
    assert out2.shape == ref2.shape == (3, 30 * 32), (out2.shape, ref2.shape)
    assert jnp.allclose(out2, ref2, atol=2e-3, rtol=2e-3), float(jnp.max(jnp.abs(out2 - ref2)))

    print("KERNEL_OK")
</pallas_src>

<mosaic_0001>
module attributes {stable_mosaic.version = 11 : i64} {
  func.func @kernel(%arg0: i32, %arg1: memref<8x128xf32, #tpu.memory_space<vmem>>, %arg2: memref<128x112xf32, #tpu.memory_space<vmem>>, %arg3: memref<1x112xf32, #tpu.memory_space<vmem>>, %arg4: memref<112x64xf32, #tpu.memory_space<vmem>>, %arg5: memref<1x64xf32, #tpu.memory_space<vmem>>, %arg6: memref<8x64xf32, #tpu.memory_space<vmem>>, %arg7: memref<8x112xf32, #tpu.memory_space<vmem>>) attributes {dimension_semantics = [#tpu.dimension_semantics<parallel>], iteration_bounds = array<i64: 1>, scalar_prefetch = 0 : i64, scratch_operands = 1 : i64, tpu.core_type = #tpu.core_type<tc>, window_params = [{transform_indices = @transform_0, window_bounds = array<i64: 8, 128>}, {pipeline_mode = #tpu.pipeline_mode<synchronous>, transform_indices = @transform_1, window_bounds = array<i64: 128, 112>}, {pipeline_mode = #tpu.pipeline_mode<synchronous>, transform_indices = @transform_2, window_bounds = array<i64: 1, 112>}, {pipeline_mode = #tpu.pipeline_mode<synchronous>, transform_indices = @transform_3, window_bounds = array<i64: 112, 64>}, {pipeline_mode = #tpu.pipeline_mode<synchronous>, transform_indices = @transform_4, window_bounds = array<i64: 1, 64>}, {transform_indices = @transform_5, window_bounds = array<i64: 8, 64>}]} {
    %c0 = arith.constant 0 : index
    %c0_0 = arith.constant 0 : index
    %0 = vector.load %arg2[%c0, %c0_0] : memref<128x112xf32, #tpu.memory_space<vmem>>, vector<128x112xf32>
    %c0_1 = arith.constant 0 : index
    %c0_2 = arith.constant 0 : index
    %1 = vector.load %arg3[%c0_1, %c0_2] : memref<1x112xf32, #tpu.memory_space<vmem>>, vector<1x112xf32>
    %2 = vector.shape_cast %1 : vector<1x112xf32> to vector<1x112xf32>
    %3 = vector.broadcast %2 : vector<1x112xf32> to vector<8x112xf32>
    %c0_3 = arith.constant 0 : index
    %c0_4 = arith.constant 0 : index
    %4 = vector.load %arg1[%c0_3, %c0_4] : memref<8x128xf32, #tpu.memory_space<vmem>>, vector<8x128xf32>
    %cst = arith.constant dense<0.000000e+00> : vector<8x112xf32>
    %5 = tpu.matmul %4, %0, %cst {dimension_numbers = #tpu.dot_dimension_numbers<[1], [0], [0], [1], [0, 0, 1, 1], [], []>} : vector<8x128xf32>, vector<128x112xf32>, vector<8x112xf32> -> vector<8x112xf32>
    %6 = arith.addf %5, %3 : vector<8x112xf32>
    %cst_5 = arith.constant 0.000000e+00 : f32
    %7 = vector.broadcast %cst_5 : f32 to vector<8x112xf32>
    %8 = arith.cmpf oge, %6, %7 : vector<8x112xf32>
    %cst_6 = arith.constant 0.00999999977 : f32
    %9 = vector.broadcast %cst_6 : f32 to vector<8x112xf32>
    %10 = arith.mulf %9, %6 : vector<8x112xf32>
    %11 = arith.select %8, %6, %10 : vector<8x112xi1>, vector<8x112xf32>
    %c0_7 = arith.constant 0 : index
    %c0_8 = arith.constant 0 : index
    %12 = vector.load %arg5[%c0_7, %c0_8] : memref<1x64xf32, #tpu.memory_space<vmem>>, vector<1x64xf32>
    %13 = vector.shape_cast %12 : vector<1x64xf32> to vector<1x64xf32>
    %14 = vector.broadcast %13 : vector<1x64xf32> to vector<8x64xf32>
    %c0_9 = arith.constant 0 : index
    %c0_10 = arith.constant 0 : index
    %15 = vector.load %arg4[%c0_9, %c0_10] : memref<112x64xf32, #tpu.memory_space<vmem>>, vector<112x64xf32>
    %cst_11 = arith.constant dense<0.000000e+00> : vector<8x64xf32>
    %16 = tpu.matmul %11, %15, %cst_11 {dimension_numbers = #tpu.dot_dimension_numbers<[1], [0], [0], [1], [0, 0, 1, 1], [], []>} : vector<8x112xf32>, vector<112x64xf32>, vector<8x64xf32> -> vector<8x64xf32>
    %17 = arith.addf %16, %14 : vector<8x64xf32>
    %cst_12 = arith.constant 0.000000e+00 : f32
    %18 = vector.broadcast %cst_12 : f32 to vector<8x64xf32>
    %19 = arith.cmpf oge, %17, %18 : vector<8x64xf32>
    %cst_13 = arith.constant 0.00999999977 : f32
    %20 = vector.broadcast %cst_13 : f32 to vector<8x64xf32>
    %21 = arith.mulf %20, %17 : vector<8x64xf32>
    %22 = arith.select %19, %17, %21 : vector<8x64xi1>, vector<8x64xf32>
    %c0_14 = arith.constant 0 : index
    %c0_15 = arith.constant 0 : index
    %23 = vector.load %arg6[%c0_14, %c0_15] : memref<8x64xf32, #tpu.memory_space<vmem>>, vector<8x64xf32>
    tpu.vector_store %arg6[%c0_14, %c0_15], %22 {strides = array<i32>} : memref<8x64xf32, #tpu.memory_space<vmem>>, vector<8x64xf32>,
    return
  }
  func.func @transform_0(%arg0: i32) -> (i32, i32) {
    %c0_i32 = arith.constant 0 : i32
    %c0_i32_0 = arith.constant 0 : i32
    return %arg0, %c0_i32 : i32, i32
  }
  func.func @transform_1(%arg0: i32) -> (i32, i32) {
    %c0_i32 = arith.constant 0 : i32
    %c0_i32_0 = arith.constant 0 : i32
    %c0_i32_1 = arith.constant 0 : i32
    return %c0_i32, %c0_i32_0 : i32, i32
  }
  func.func @transform_2(%arg0: i32) -> (i32, i32) {
    %c0_i32 = arith.constant 0 : i32
    %c0_i32_0 = arith.constant 0 : i32
    %c0_i32_1 = arith.constant 0 : i32
    return %c0_i32, %c0_i32_0 : i32, i32
  }
  func.func @transform_3(%arg0: i32) -> (i32, i32) {
    %c0_i32 = arith.constant 0 : i32
    %c0_i32_0 = arith.constant 0 : i32
    %c0_i32_1 = arith.constant 0 : i32
    return %c0_i32, %c0_i32_0 : i32, i32
  }
  func.func @transform_4(%arg0: i32) -> (i32, i32) {
    %c0_i32 = arith.constant 0 : i32
    %c0_i32_0 = arith.constant 0 : i32
    %c0_i32_1 = arith.constant 0 : i32
    return %c0_i32, %c0_i32_0 : i32, i32
  }
  func.func @transform_5(%arg0: i32) -> (i32, i32) {
    %c0_i32 = arith.constant 0 : i32
    %c0_i32_0 = arith.constant 0 : i32
    return %arg0, %c0_i32 : i32, i32
  }
}

</mosaic_0001>

<bundles_post_ra>
// kernel: tile.8
= control target key start
LH: loop header
LB: loop body
LE: loop exit
PB: predicated region body
PF: predicated region fallthrough
CT: control target
= control target key end

     0   :  { %s22_s0 = inlined_call_operand.vmem [shape: f32[16], index: 0, kind: input, shape index: {}]   ;;  %s23_s1 = inlined_call_operand.vmem [shape: f32[7,16], index: 1, kind: output, shape index: {}]  }
   0x1   :  { %v4_v0 = vld [vmem:[%s22_s0] ss:$0 sm:$0xff] }
   0x2   :  { %5 = vst [vmem:[%s23_s1] sm:$0xff] %v4_v0 }

// kernel: tile.9
= control target key start
LH: loop header
LB: loop body
LE: loop exit
PB: predicated region body
PF: predicated region fallthrough
CT: control target
= control target key end

     0   :  { %s59_s10 = smov 96   ;;  %s60_s11 = smov 64   ;;  %vm3_vm0 = vcmask 130048   ;;  %vm9_vm1 = vcmask 917248   ;;  %vm15_vm2 = vcmask 786048   ;;  %vm21_vm3 = vcmask 654848   ;;  %s99_s0 = inlined_call_operand.vmem [shape: f32[7,16], index: 0, kind: input, shape index: {}]   ;;  %s100_s1 = inlined_call_operand.vmem [shape: f32[1,112], index: 1, kind: output, shape index: {}]  }
   0x1   :  { %v47_v0 = vld [vmem:[%s99_s0 + $0x6] sm:$0x1]   ;;  %v49_v1 = vld [vmem:[%s99_s0 + $0x4] sm:$0x1]   ;;  %v48_v2 = vld [vmem:[%s99_s0 + $0x5] sm:$0x1]  }
   0x2   :  { %7 = vrot.lane.b32.xlu0 %v47_v0, %s59_s10  ;;  %19 = vrot.lane.b32.xlu1 %v49_v1, %s60_s11  ;;  %v50_v3 = vld [vmem:[%s99_s0 + $0x3] sm:$0x1]   ;;  %v2_v4 = vld [vmem:[%s99_s0] sm:$0x1]   ;;  %s61_s18 = smov 80   ;;  %s62_s19 = smov 48  }
   0x3   :  { %4 = vst.msk [vmem:[#allocation0] sm:$0x1] %vm3_vm0, %v2_v4   ;;  %v51_v5 = vld [vmem:[%s99_s0 + $0x2] sm:$0x1]   ;;  %v52_v6 = vld [vmem:[%s99_s0 + $0x1] sm:$0x1]  }
   0x4   :  { %s63_s0 = smov 32   ;;  %s64_s24 = smov 16   ;;  %vm27_vm4 = vcmask 523648   ;;  %vm33_vm5 = vcmask 392448   ;;  %vm39_vm6 = vcmask 261248  }
   0x6   :  { %13 = vrot.lane.b32.xlu0 %v48_v2, %s61_s18  ;;  %25 = vrot.lane.b32.xlu1 %v50_v3, %s62_s19 }
   0xa   :  { %31 = vrot.lane.b32.xlu0 %v51_v5, %s63_s0  ;;  %37 = vrot.lane.b32.xlu1 %v52_v6, %s64_s24 }
  0x74   :  { %v8_v7 = vpop.permute.xlu0 %7   ;;  %v20_v8 = vpop.permute.xlu1 %19  }
  0x75   :  { %10 = vst.msk [vmem:[#allocation0] sm:$0x1] %vm9_vm1, %v8_v7  }
  0x78   :  { %v14_v9 = vpop.permute.xlu0 %13   ;;  %v26_v10 = vpop.permute.xlu1 %25  }
  0x79   :  { %16 = vst.msk [vmem:[#allocation0] sm:$0x1] %vm15_vm2, %v14_v9  }
  0x7a   :  { %22 = vst.msk [vmem:[#allocation0] sm:$0x1] %vm21_vm3, %v20_v8  }
  0x7b   :  { %28 = vst.msk [vmem:[#allocation0] sm:$0x1] %vm27_vm4, %v26_v10  }
  0x7c   :  { %v32_v11 = vpop.permute.xlu0 %31   ;;  %v38_v12 = vpop.permute.xlu1 %37  }
  0x7d   :  { %34 = vst.msk [vmem:[#allocation0] sm:$0x1] %vm33_vm5, %v32_v11  }
  0x7e   :  { %40 = vst.msk [vmem:[#allocation0] sm:$0x1] %vm39_vm6, %v38_v12  }
  0x85   :  { %v44_v13 = vld [vmem:[#allocation0] sm:$0x1] }
  0x86   :  { %46 = vst [vmem:[%s100_s1] sm:$0x1] %v44_v13 }

// kernel: conv1d_layers_forward.1
= control target key start
LH: loop header
LB: loop body
LE: loop exit
PB: predicated region body
PF: predicated region fallthrough
CT: control target
= control target key end

     0   :  { %v370_v0 = vmov 0.0|0.0   ;;  %vm371_vm0 = vmmov 0   ;;  %v372_v4 = vmov 0.0   ;;  %vm138_vm2 = vcmask 916480   ;;  %s520_s1 = inlined_call_operand.vmem [shape: f32[128,112], index: 1, kind: input, shape index: {}]   ;;  %s521_s3 = inlined_call_operand.vmem [shape: f32[112,64], index: 3, kind: input, shape index: {}]   ;;  %s522_s0 = inlined_call_operand.vmem [shape: f32[8,128], index: 0, kind: input, shape index: {}]   ;;  %s523_s2 = inlined_call_operand.vmem [shape: f32[1,112], index: 2, kind: input, shape index: {}]   ;;  %s524_s4 = inlined_call_operand.vmem [shape: f32[1,64], index: 4, kind: input, shape index: {}]   ;;  %s525_s5 = inlined_call_operand.vmem [shape: f32[8,64], index: 5, kind: output, shape index: {}]  }
   0x1   :  { %322 = vmatprep.subr.bf16.mxu0 %v370_v0  ;;  %v20_v1 = vld [vmem:[%s520_s1] sm:$0xff]  ;;  %v21_v2 = vld [vmem:[%s520_s1 + $0x8] sm:$0xff]  ;;  %v22_v3 = vld [vmem:[%s520_s1 + $0x10] sm:$0xff]  ;;  %288 = vmatprep.mubr.msk.f32.mxu0 %vm371_vm0, %v372_v4  ;;  %vm215_vm4 = vcmask 523264  }
   0x2   :  { %v323_v5 = vpack.c.bf16 %v21_v2, %v20_v1  ;;  %v23_v6 = vld [vmem:[%s520_s1 + $0x18] sm:$0xff]  ;;  %346 = vmatprep.subr.bf16.mxu1 %v370_v0  ;;  %319 = vmatprep.mubr.msk.f32.mxu1 %vm371_vm0, %v372_v4  ;;  %v24_v8 = vld [vmem:[%s520_s1 + $0x20] sm:$0xff]  ;;  %v25_v9 = vld [vmem:[%s520_s1 + $0x28] sm:$0xff] }
   0x3   :  { %v326_v7 = vpack.c.bf16 %v23_v6, %v22_v3  ;;  %v124_v10 = vld [vmem:[%s521_s3] sm:$0xff]  ;;  %v125_v11 = vld [vmem:[%s521_s3 + $0x8] sm:$0xff]  ;;  %v126_v12 = vld [vmem:[%s521_s3 + $0x10] sm:$0xff]  ;;  %v329_v14 = vpack.c.bf16 %v25_v9, %v24_v8 }
   0x4   :  { %324 = vmatpush3.bf16.msra.mxu0 %v323_v5  ;;  %v127_v13 = vld [vmem:[%s521_s3 + $0x18] sm:$0xff]  ;;  %v347_v15 = vpack.c.bf16 %v125_v11, %v124_v10  ;;  %v26_v16 = vld [vmem:[%s520_s1 + $0x30] sm:$0xff]  ;;  %v128_v19 = vld [vmem:[%s521_s3 + $0x20] sm:$0xff] }
   0x5   :  { %325 = vmatprep.subr.bf16.mxu0 %v370_v0  ;;  %v27_v17 = vld [vmem:[%s520_s1 + $0x38] sm:$0xff]  ;;  %v350_v18 = vpack.c.bf16 %v127_v13, %v126_v12  ;;  %v129_v20 = vld [vmem:[%s521_s3 + $0x28] sm:$0xff]  ;;  %v28_v22 = vld [vmem:[%s520_s1 + $0x40] sm:$0xff] }
   0x6   :  { %348 = vmatpush3.bf16.msra.mxu1 %v347_v15  ;;  %v332_v21 = vpack.c.bf16 %v27_v17, %v26_v16  ;;  %v29_v23 = vld [vmem:[%s520_s1 + $0x48] sm:$0xff]  ;;  %v353_v24 = vpack.c.bf16 %v129_v20, %v128_v19  ;;  %v130_v25 = vld [vmem:[%s521_s3 + $0x30] sm:$0xff]  ;;  %v131_v26 = vld [vmem:[%s521_s3 + $0x38] sm:$0xff] }
   0x7   :  { %349 = vmatprep.subr.bf16.mxu1 %v370_v0  ;;  %v335_v27 = vpack.c.bf16 %v29_v23, %v28_v22  ;;  %v30_v28 = vld [vmem:[%s520_s1 + $0x50] sm:$0xff]  ;;  %v31_v29 = vld [vmem:[%s520_s1 + $0x58] sm:$0xff]  ;;  %v356_v30 = vpack.c.bf16 %v131_v26, %v130_v25  ;;  %v132_v31 = vld [vmem:[%s521_s3 + $0x40] sm:$0xff] }
   0x8   :  { %327 = vmatpush3.bf16.msra.mxu0 %v326_v7  ;;  %v133_v32 = vld [vmem:[%s521_s3 + $0x48] sm:$0xff]  ;;  %v338_v33 = vpack.c.bf16 %v31_v29, %v30_v28  ;;  %v32_v34 = vld [vmem:[%s520_s1 + $0x60] sm:$0xff]  ;;  %v134_v37 = vld [vmem:[%s521_s3 + $0x50] sm:$0xff] }
   0x9   :  { %328 = vmatprep.subr.bf16.mxu0 %v370_v0  ;;  %v33_v35 = vld [vmem:[%s520_s1 + $0x68] sm:$0xff]  ;;  %v359_v36 = vpack.c.bf16 %v133_v32, %v132_v31  ;;  %v135_v38 = vld [vmem:[%s521_s3 + $0x58] sm:$0xff]  ;;  %v34_v40 = vld [vmem:[%s520_s1 + $0x70] sm:$0xff] }
   0xa   :  { %351 = vmatpush3.bf16.msra.mxu1 %v350_v18  ;;  %v341_v39 = vpack.c.bf16 %v33_v35, %v32_v34  ;;  %v35_v41 = vld [vmem:[%s520_s1 + $0x78] sm:$0xff]  ;;  %v362_v42 = vpack.c.bf16 %v135_v38, %v134_v37  ;;  %v43_v44 = vld [vmem:[%s522_s0] sm:$0xff]  ;;  %v137_v46 = vld [vmem:[%s521_s3 + $0x68] sm:$0xff] }
   0xb   :  { %352 = vmatprep.subr.bf16.mxu1 %v370_v0  ;;  %v344_v43 = vpack.c.bf16 %v35_v41, %v34_v40  ;;  %v136_v45 = vld [vmem:[%s521_s3 + $0x60] sm:$0xff] }
   0xc   :  { %330 = vmatpush3.bf16.msra.mxu0 %v329_v14  ;;  %v365_v47 = vpack.c.bf16 %v137_v46, %v136_v45  ;;  %v221_v48 = vld [vmem:[%s523_s2] ss:$0 sm:$0xff] }
   0xd   :  { %331 = vmatprep.subr.bf16.mxu0 %v370_v0  ;;  %v222_v54 = vld [vmem:[%s524_s4] ss:$0 sm:$0xff] }
   0xe   :  { %354 = vmatpush3.bf16.msra.mxu1 %v353_v24 }
   0xf   :  { %355 = vmatprep.subr.bf16.mxu1 %v370_v0 }
  0x10   :  { %333 = vmatpush3.bf16.msra.mxu0 %v332_v21 }
  0x11   :  { %334 = vmatprep.subr.bf16.mxu0 %v370_v0 }
  0x12   :  { %357 = vmatpush3.bf16.msra.mxu1 %v356_v30 }
  0x13   :  { %358 = vmatprep.subr.bf16.mxu1 %v370_v0 }
  0x14   :  { %336 = vmatpush3.bf16.msra.mxu0 %v335_v27 }
  0x15   :  { %337 = vmatprep.subr.bf16.mxu0 %v370_v0 }
  0x16   :  { %360 = vmatpush3.bf16.msra.mxu1 %v359_v36 }
  0x17   :  { %361 = vmatprep.subr.bf16.mxu1 %v370_v0 }
  0x18   :  { %339 = vmatpush3.bf16.msra.mxu0 %v338_v33 }
  0x19   :  { %340 = vmatprep.subr.bf16.mxu0 %v370_v0 }
  0x1a   :  { %363 = vmatpush3.bf16.msra.mxu1 %v362_v42 }
  0x1b   :  { %364 = vmatprep.subr.bf16.mxu1 %v370_v0 }
  0x1c   :  { %342 = vmatpush3.bf16.msra.mxu0 %v341_v39 }
  0x1d   :  { %343 = vmatprep.subr.bf16.mxu0 %v370_v0 }
  0x1e   :  { %366 = vmatpush3.bf16.msra.mxu1 %v365_v47 }
  0x20   :  { %345 = vmatpush3.bf16.msra.mxu0 %v344_v43 }
  0x23   :  { %289 = vmatmul.mubr.f32.vlgmr.msra.gmra.mrb[0].mxu0 %v43_v44 }
  0xf6   :  { %v110_v49 = vpop.f32.mrb[0].mxu0 }
  0xf7   :  { %v111_v50 = vadd.f32 %v221_v48, %v110_v49  ;;  %v290_v51 = vpop.f32.mrb[1].mxu0 }
  0xf9   :  { %vm114_vm1 = vcmp.ge.f32.partialorder %v111_v50, 0.0  ;;  %v115_v52 = vmul.f32 0.01, %v111_v50 }
  0xfb   :  { %v116_v53 = vsel %vm114_vm1, %v111_v50, %v115_v52 }
  0xfc   :  { %320 = vmatmul.mubr.msk.f32.vlgmr.msra.gmra.mrb[0].mxu1 %vm138_vm2, %v116_v53 }
 0x1cf   :  { %v208_v55 = vpop.f32.mrb[0].mxu1 }
 0x1d0   :  { %v209_v56 = vadd.f32 %v222_v54, %v208_v55  ;;  %v321_v57 = vpop.f32.mrb[1].mxu1 }
 0x1d2   :  { %vm212_vm3 = vcmp.ge.f32.partialorder %v209_v56, 0.0  ;;  %v213_v58 = vmul.f32 0.01, %v209_v56 }
 0x1d4   :  { %v214_v59 = vsel %vm212_vm3, %v209_v56, %v213_v58 }
 0x1d5   :  { %216 = vst.msk [vmem:[%s525_s5] sm:$0xff] %vm215_vm4, %v214_v59 }

</bundles_post_ra>
